<compile_context>
chip_gen: v5e
topology: v5e:2x2
jax: 0.10.0
libtpu: 0.0.40
codegen_flags: <defaults>
</compile_context>

<pallas_src>
import functools

import jax
import jax.numpy as jnp
from jax.experimental import pallas as pl
from jax.experimental.pallas import tpu as pltpu


_LN_EPS = 1e-5
_NEG_INF = -1e9


def _mxdot(a, b):
    """MXU matmul with bf16 inputs and f32 accumulation (fast on v5e/v6e/v7x)."""
    return jnp.dot(a.astype(jnp.bfloat16), b.astype(jnp.bfloat16),
                   preferred_element_type=jnp.float32)


# ----------------------------------------------------------------------------
# Fused multi-head attention + residual + LayerNorm (one grid step per batch)
# ----------------------------------------------------------------------------
def _mha_ln_kernel(q_ref, k_ref, v_ref, amask_ref, kbias_ref,
                   wq_ref, bq_ref, wk_ref, bk_ref, wv_ref, bv_ref,
                   wo_ref, bo_ref, g_ref, beta_ref, o_ref,
                   *, num_heads, scale):
    xq = q_ref[0].astype(jnp.float32)            # (Tq, D) query input == residual
    xk = k_ref[0]                                # (Tk, D)
    xv = v_ref[0]                                # (Tk, D)
    bias = amask_ref[...] + kbias_ref[0]         # (Tq, Tk) additive mask, built in-kernel

    Tq, D = xq.shape
    acc = jnp.zeros((Tq, D), jnp.float32)
    # Static unroll over heads: all H heads processed in this single grid step.
    for h in range(num_heads):
        q_h = _mxdot(xq, wq_ref[h]) + bq_ref[h]                      # (Tq, dh)
        k_h = _mxdot(xk, wk_ref[h]) + bk_ref[h]                      # (Tk, dh)
        v_h = _mxdot(xv, wv_ref[h]) + bv_ref[h]                      # (Tk, dh)
        s = jnp.dot(q_h, k_h.T, preferred_element_type=jnp.float32) * scale + bias
        m = jnp.max(s, axis=-1, keepdims=True)
        p = jnp.exp(s - m)
        p = p * pl.reciprocal(jnp.sum(p, axis=-1, keepdims=True), approx=True)
        o_h = jnp.dot(p, v_h, preferred_element_type=jnp.float32)    # (Tq, dh)
        acc = acc + _mxdot(o_h, wo_ref[h])                           # (Tq, D)
    attn = acc + bo_ref[...]

    # residual + LayerNorm epilogue (per-row reduction over features only)
    z = xq + attn
    mu = jnp.mean(z, axis=-1, keepdims=True)
    var = jnp.mean((z - mu) ** 2, axis=-1, keepdims=True)
    y = (z - mu) * jax.lax.rsqrt(var + _LN_EPS) * g_ref[...] + beta_ref[...]
    o_ref[0] = y.astype(o_ref.dtype)


def mha_ln(q_in, k_in, v_in, attn_mask, key_bias, weights, ln_g, ln_b, num_heads):
    """q_in: (B,Tq,D), k_in/v_in: (B,Tk,D), attn_mask: (Tq,Tk) additive (shared),
    key_bias: (B,1,Tk) additive key-padding bias. Returns LN(q_in + MHA(...))."""
    wq_h, bq_h, wk_h, bk_h, wv_h, bv_h, wo_h, bo = weights
    B, Tq, D = q_in.shape
    Tk = k_in.shape[1]
    dh = D // num_heads
    scale = 1.0 / (dh ** 0.5)

    const2 = lambda b: (0, 0)
    const3 = lambda b: (0, 0, 0)
    perb3 = lambda b: (b, 0, 0)

    return pl.pallas_call(
        functools.partial(_mha_ln_kernel, num_heads=num_heads, scale=scale),
        out_shape=jax.ShapeDtypeStruct((B, Tq, D), q_in.dtype),
        grid=(B,),
        in_specs=[
            pl.BlockSpec((1, Tq, D), perb3),            # q_in (also residual)
            pl.BlockSpec((1, Tk, D), perb3),            # k_in
            pl.BlockSpec((1, Tk, D), perb3),            # v_in
            pl.BlockSpec((Tq, Tk), const2),             # shared additive attn mask
            pl.BlockSpec((1, 1, Tk), perb3),            # per-batch key-padding bias
            pl.BlockSpec((num_heads, D, dh), const3),   # Wq per head (bf16)
            pl.BlockSpec((num_heads, 1, dh), const3),   # bq per head
            pl.BlockSpec((num_heads, D, dh), const3),   # Wk
            pl.BlockSpec((num_heads, 1, dh), const3),   # bk
            pl.BlockSpec((num_heads, D, dh), const3),   # Wv
            pl.BlockSpec((num_heads, 1, dh), const3),   # bv
            pl.BlockSpec((num_heads, dh, D), const3),   # Wo per head (bf16)
            pl.BlockSpec((1, D), const2),               # bo
            pl.BlockSpec((1, D), const2),               # LN gamma
            pl.BlockSpec((1, D), const2),               # LN beta
        ],
        out_specs=pl.BlockSpec((1, Tq, D), perb3),
        compiler_params=pltpu.CompilerParams(dimension_semantics=("parallel",)),
    )(q_in, k_in, v_in, attn_mask, key_bias,
      wq_h, bq_h, wk_h, bk_h, wv_h, bv_h, wo_h, bo,
      ln_g.reshape(1, D), ln_b.reshape(1, D))


# ----------------------------------------------------------------------------
# Fused FFN + residual + LayerNorm, row tiled
# ----------------------------------------------------------------------------
def _ffn_ln_kernel(x_ref, w1_ref, b1_ref, w2_ref, b2_ref, g_ref, beta_ref, o_ref):
    x = x_ref[...].astype(jnp.float32)
    h = jnp.maximum(_mxdot(x, w1_ref[...]) + b1_ref[...], 0.0)
    y = _mxdot(h, w2_ref[...]) + b2_ref[...]
    z = x + y
    mu = jnp.mean(z, axis=-1, keepdims=True)
    var = jnp.mean((z - mu) ** 2, axis=-1, keepdims=True)
    o = (z - mu) * jax.lax.rsqrt(var + _LN_EPS) * g_ref[...] + beta_ref[...]
    o_ref[...] = o.astype(o_ref.dtype)


def ffn_ln(x, w1, b1, w2, b2, ln_g, ln_b, tm=256):
    M, D = x.shape
    F = w1.shape[1]
    tm = min(tm, M)   # one big row tile (or 256-row tiles for large M)
    return pl.pallas_call(
        _ffn_ln_kernel,
        out_shape=jax.ShapeDtypeStruct((M, D), x.dtype),
        grid=(pl.cdiv(M, tm),),
        in_specs=[
            pl.BlockSpec((tm, D), lambda i: (i, 0)),
            pl.BlockSpec((D, F), lambda i: (0, 0)),
            pl.BlockSpec((1, F), lambda i: (0, 0)),
            pl.BlockSpec((F, D), lambda i: (0, 0)),
            pl.BlockSpec((1, D), lambda i: (0, 0)),
            pl.BlockSpec((1, D), lambda i: (0, 0)),
            pl.BlockSpec((1, D), lambda i: (0, 0)),
        ],
        out_specs=pl.BlockSpec((tm, D), lambda i: (i, 0)),
        compiler_params=pltpu.CompilerParams(dimension_semantics=("parallel",)),
    )(x, w1.astype(jnp.bfloat16), b1.reshape(1, F), w2.astype(jnp.bfloat16),
      b2.reshape(1, D), ln_g.reshape(1, D), ln_b.reshape(1, D))


# ----------------------------------------------------------------------------
# MLP head: D -> 512 -> 512 -> vocab, tiled over (rows, vocab)
# ----------------------------------------------------------------------------
def _mlp_head_kernel(x_ref, w1_ref, b1_ref, w2_ref, b2_ref, w3_ref, b3_ref,
                     o_ref, h_ref):
    # Hidden activations depend only on the row tile; compute them once per row
    # tile (vocab axis is the innermost grid axis) and reuse across vocab tiles.
    @pl.when(pl.program_id(1) == 0)
    def _():
        h1 = jnp.maximum(_mxdot(x_ref[...], w1_ref[...]) + b1_ref[...], 0.0)
        h2 = jnp.maximum(_mxdot(h1, w2_ref[...]) + b2_ref[...], 0.0)
        h_ref[...] = h2
    y = _mxdot(h_ref[...], w3_ref[...]) + b3_ref[...]
    o_ref[...] = y.astype(o_ref.dtype)


def mlp_head(x, w1, b1, w2, b2, w3, b3, tm=256, tn=512):
    M, D = x.shape
    Hd = w1.shape[1]
    V = w3.shape[1]
    tm = min(tm, M)
    tn = min(tn, V)   # lane-dense vocab tiles; w3 never has to be fully resident
    return pl.pallas_call(
        _mlp_head_kernel,
        out_shape=jax.ShapeDtypeStruct((M, V), x.dtype),
        grid=(pl.cdiv(M, tm), pl.cdiv(V, tn)),
        in_specs=[
            pl.BlockSpec((tm, D), lambda i, j: (i, 0)),
            pl.BlockSpec((D, Hd), lambda i, j: (0, 0)),
            pl.BlockSpec((1, Hd), lambda i, j: (0, 0)),
            pl.BlockSpec((Hd, Hd), lambda i, j: (0, 0)),
            pl.BlockSpec((1, Hd), lambda i, j: (0, 0)),
            pl.BlockSpec((Hd, tn), lambda i, j: (0, j)),
            pl.BlockSpec((1, tn), lambda i, j: (0, j)),
        ],
        out_specs=pl.BlockSpec((tm, tn), lambda i, j: (i, j)),
        scratch_shapes=[pltpu.VMEM((tm, Hd), jnp.float32)],
        compiler_params=pltpu.CompilerParams(
            dimension_semantics=("parallel", "arbitrary"),
            vmem_limit_bytes=32 * 1024 * 1024,
        ),
    )(x, w1.astype(jnp.bfloat16), b1.reshape(1, Hd), w2.astype(jnp.bfloat16),
      b2.reshape(1, Hd), w3.astype(jnp.bfloat16), b3.reshape(1, V))


# ----------------------------------------------------------------------------
# Glue (plain JAX): per-head weight views, decoder-layer wiring
# ----------------------------------------------------------------------------
def _attn_weights(p, prefix, num_heads):
    D = p[f"{prefix}_wq"].shape[0]
    dh = D // num_heads

    def split_cols(w, b):
        w_h = w.reshape(D, num_heads, dh).transpose(1, 0, 2).astype(jnp.bfloat16)  # (H,D,dh)
        b_h = b.reshape(num_heads, 1, dh).astype(jnp.float32)                      # (H,1,dh)
        return w_h, b_h

    wq_h, bq_h = split_cols(p[f"{prefix}_wq"], p[f"{prefix}_bq"])
    wk_h, bk_h = split_cols(p[f"{prefix}_wk"], p[f"{prefix}_bk"])
    wv_h, bv_h = split_cols(p[f"{prefix}_wv"], p[f"{prefix}_bv"])
    wo_h = p[f"{prefix}_wo"].reshape(num_heads, dh, D).astype(jnp.bfloat16)        # (H,dh,D)
    bo = p[f"{prefix}_bo"].reshape(1, D)
    return wq_h, bq_h, wk_h, bk_h, wv_h, bv_h, wo_h, bo


def decoder_forward(p, memory, mask, pos, target, target_mask, num_heads):
    """Single DETR-style transformer decoder layer (post-norm). Batch-major internally."""
    T, B, D = target.shape
    S = memory.shape[0]

    # sequence-major -> batch-major once at the boundary
    tgt_b = target.transpose(1, 0, 2)              # (B, T, D)
    mem_b = memory.transpose(1, 0, 2)              # (B, S, D)
    kmem_b = (memory + pos).transpose(1, 0, 2)     # (B, S, D): pos added to keys (DETR)

    # compact masks; the -1e9 bias is applied inside the attention kernel,
    # never materialized as a (B*H, Tq, Tk) tensor in HBM.
    self_amask = target_mask.astype(jnp.float32)                    # (T, T) causal, additive
    self_kbias = jnp.zeros((B, 1, T), jnp.float32)                  # no key padding
    cross_amask = jnp.zeros((T, S), jnp.float32)
    cross_kbias = jnp.where(mask, _NEG_INF, 0.0).astype(jnp.float32)[:, None, :]  # (B,1,S)

    sa_w = _attn_weights(p, "sa", num_heads)
    ca_w = _attn_weights(p, "ca", num_heads)

    # self-attention + residual + LN  (one fused pallas_call, grid over batch)
    x = mha_ln(tgt_b, tgt_b, tgt_b, self_amask, self_kbias, sa_w,
               p["ln1_g"], p["ln1_b"], num_heads)
    # cross-attention + residual + LN
    x = mha_ln(x, kmem_b, mem_b, cross_amask, cross_kbias, ca_w,
               p["ln2_g"], p["ln2_b"], num_heads)
    # FFN + residual + LN (one fused pallas_call over B*T token rows)
    x2 = ffn_ln(x.reshape(B * T, D), p["ffn_w1"], p["ffn_b1"],
                p["ffn_w2"], p["ffn_b2"], p["ln3_g"], p["ln3_b"])
    return x2.reshape(B, T, D)


def caption_decoder_forward(params, memory, mask, pos, target, target_mask, num_heads=4):
    # hs = self.decoder(memory, mask, pos[-1], target, target_mask)
    # hs is produced batch-major (B, T, D), so hs.permute(1, 0, 2) is already done.
    hs = decoder_forward(params, memory, mask, pos[-1], target, target_mask, num_heads)
    B, T, D = hs.shape
    # out = self.mlp(hs.permute(1, 0, 2))
    out = mlp_head(hs.reshape(B * T, D),
                   params["mlp_w1"], params["mlp_b1"],
                   params["mlp_w2"], params["mlp_b2"],
                   params["mlp_w3"], params["mlp_b3"])
    return out.reshape(B, T, -1)


# ----------------------------------------------------------------------------
# Deterministic synthetic parameters
# ----------------------------------------------------------------------------
def init_params(key, D=32, ffn_dim=64, mlp_hidden=512, vocab=128):
    keys = iter(jax.random.split(key, 32))

    def w(shape):
        return jax.random.normal(next(keys), shape, jnp.float32) * 0.02

    def z(n):
        return jnp.zeros((n,), jnp.float32)

    p = {}
    for pre in ("sa", "ca"):
        for nm in ("q", "k", "v", "o"):
            p[f"{pre}_w{nm}"] = w((D, D))
            p[f"{pre}_b{nm}"] = z(D)
    p["ffn_w1"], p["ffn_b1"] = w((D, ffn_dim)), z(ffn_dim)
    p["ffn_w2"], p["ffn_b2"] = w((ffn_dim, D)), z(D)
    for i in (1, 2, 3):
        p[f"ln{i}_g"] = jnp.ones((D,), jnp.float32)
        p[f"ln{i}_b"] = z(D)
    # MLP(hidden_dim, 512, vocab_size, 3): Linear(D,512) -> Linear(512,512) -> Linear(512,vocab)
    p["mlp_w1"], p["mlp_b1"] = w((D, mlp_hidden)), z(mlp_hidden)
    p["mlp_w2"], p["mlp_b2"] = w((mlp_hidden, mlp_hidden)), z(mlp_hidden)
    p["mlp_w3"], p["mlp_b3"] = w((mlp_hidden, vocab)), z(vocab)
    return p


# ----------------------------------------------------------------------------
# Example run
# ----------------------------------------------------------------------------
if __name__ == "__main__":
    B, T, S, D, H, V = 2, 8, 16, 32, 4, 128
    key = jax.random.PRNGKey(0)
    k1, k2, k3, kp = jax.random.split(key, 4)

    memory = jax.random.normal(k1, (S, B, D), jnp.float32)          # encoder memory (S, B, D)
    pos = jax.random.normal(k2, (1, S, B, D), jnp.float32)          # pos[-1] used, as in PyTorch
    target = jax.random.normal(k3, (T, B, D), jnp.float32)          # target embeddings (T, B, D)
    mask = jnp.zeros((B, S), jnp.bool_).at[0, S - 4:].set(True)     # key-padding mask, True = pad
    target_mask = jnp.where(jnp.tril(jnp.ones((T, T), jnp.float32)) == 1.0, 0.0, -1e9)  # causal

    params = init_params(kp, D=D, vocab=V)
    out = caption_decoder_forward(params, memory, mask, pos, target, target_mask, num_heads=H)
    out = jax.block_until_ready(out)
    assert out.shape == (B, T, V), out.shape
    assert jnp.all(jnp.isfinite(out))
    print("KERNEL_OK")
</pallas_src>

<mosaic_0001>
module attributes {stable_mosaic.version = 11 : i64} {
  func.func @_mha_ln_kernel(%arg0: i32, %arg1: memref<1x8x32xf32, #tpu.memory_space<vmem>>, %arg2: memref<1x8x32xf32, #tpu.memory_space<vmem>>, %arg3: memref<1x8x32xf32, #tpu.memory_space<vmem>>, %arg4: memref<8x8xf32, #tpu.memory_space<vmem>>, %arg5: memref<1x1x8xf32, #tpu.memory_space<vmem>>, %arg6: memref<4x32x8xbf16, #tpu.memory_space<vmem>>, %arg7: memref<4x1x8xf32, #tpu.memory_space<vmem>>, %arg8: memref<4x32x8xbf16, #tpu.memory_space<vmem>>, %arg9: memref<4x1x8xf32, #tpu.memory_space<vmem>>, %arg10: memref<4x32x8xbf16, #tpu.memory_space<vmem>>, %arg11: memref<4x1x8xf32, #tpu.memory_space<vmem>>, %arg12: memref<4x8x32xbf16, #tpu.memory_space<vmem>>, %arg13: memref<1x32xf32, #tpu.memory_space<vmem>>, %arg14: memref<1x32xf32, #tpu.memory_space<vmem>>, %arg15: memref<1x32xf32, #tpu.memory_space<vmem>>, %arg16: memref<1x8x32xf32, #tpu.memory_space<vmem>>) attributes {dimension_semantics = [#tpu.dimension_semantics<parallel>], iteration_bounds = array<i64: 2>, scalar_prefetch = 0 : i64, scratch_operands = 0 : i64, tpu.core_type = #tpu.core_type<tc>, window_params = [{transform_indices = @transform_0, window_bounds = array<i64: 1, 8, 32>}, {transform_indices = @transform_1, window_bounds = array<i64: 1, 8, 32>}, {transform_indices = @transform_2, window_bounds = array<i64: 1, 8, 32>}, {pipeline_mode = #tpu.pipeline_mode<synchronous>, transform_indices = @transform_3, window_bounds = array<i64: 8, 8>}, {transform_indices = @transform_4, window_bounds = array<i64: 1, 1, 8>}, {pipeline_mode = #tpu.pipeline_mode<synchronous>, transform_indices = @transform_5, window_bounds = array<i64: 4, 32, 8>}, {pipeline_mode = #tpu.pipeline_mode<synchronous>, transform_indices = @transform_6, window_bounds = array<i64: 4, 1, 8>}, {pipeline_mode = #tpu.pipeline_mode<synchronous>, transform_indices = @transform_7, window_bounds = array<i64: 4, 32, 8>}, {pipeline_mode = #tpu.pipeline_mode<synchronous>, transform_indices = @transform_8, window_bounds = array<i64: 4, 1, 8>}, {pipeline_mode = #tpu.pipeline_mode<synchronous>, transform_indices = @transform_9, window_bounds = array<i64: 4, 32, 8>}, {pipeline_mode = #tpu.pipeline_mode<synchronous>, transform_indices = @transform_10, window_bounds = array<i64: 4, 1, 8>}, {pipeline_mode = #tpu.pipeline_mode<synchronous>, transform_indices = @transform_11, window_bounds = array<i64: 4, 8, 32>}, {pipeline_mode = #tpu.pipeline_mode<synchronous>, transform_indices = @transform_12, window_bounds = array<i64: 1, 32>}, {pipeline_mode = #tpu.pipeline_mode<synchronous>, transform_indices = @transform_13, window_bounds = array<i64: 1, 32>}, {pipeline_mode = #tpu.pipeline_mode<synchronous>, transform_indices = @transform_14, window_bounds = array<i64: 1, 32>}, {transform_indices = @transform_15, window_bounds = array<i64: 1, 8, 32>}]} {
    %c0 = arith.constant 0 : index
    %c0_0 = arith.constant 0 : index
    %c0_1 = arith.constant 0 : index
    %0 = vector.load %arg1[%c0, %c0_0, %c0_1] : memref<1x8x32xf32, #tpu.memory_space<vmem>>, vector<1x8x32xf32>
    %1 = vector.shape_cast %0 : vector<1x8x32xf32> to vector<8x32xf32>
    %c0_2 = arith.constant 0 : index
    %c0_3 = arith.constant 0 : index
    %c0_4 = arith.constant 0 : index
    %2 = vector.load %arg2[%c0_2, %c0_3, %c0_4] : memref<1x8x32xf32, #tpu.memory_space<vmem>>, vector<1x8x32xf32>
    %3 = vector.shape_cast %2 : vector<1x8x32xf32> to vector<8x32xf32>
    %c0_5 = arith.constant 0 : index
    %c0_6 = arith.constant 0 : index
    %c0_7 = arith.constant 0 : index
    %4 = vector.load %arg3[%c0_5, %c0_6, %c0_7] : memref<1x8x32xf32, #tpu.memory_space<vmem>>, vector<1x8x32xf32>
    %5 = vector.shape_cast %4 : vector<1x8x32xf32> to vector<8x32xf32>
    %c0_8 = arith.constant 0 : index
    %c0_9 = arith.constant 0 : index
    %6 = vector.load %arg4[%c0_8, %c0_9] : memref<8x8xf32, #tpu.memory_space<vmem>>, vector<8x8xf32>
    %c0_10 = arith.constant 0 : index
    %c0_11 = arith.constant 0 : index
    %c0_12 = arith.constant 0 : index
    %7 = vector.load %arg5[%c0_10, %c0_11, %c0_12] : memref<1x1x8xf32, #tpu.memory_space<vmem>>, vector<1x1x8xf32>
    %8 = vector.shape_cast %7 : vector<1x1x8xf32> to vector<1x8xf32>
    %9 = vector.broadcast %8 : vector<1x8xf32> to vector<8x8xf32>
    %10 = arith.addf %6, %9 : vector<8x8xf32>
    %cst = arith.constant 0.000000e+00 : f32
    %11 = vector.broadcast %cst : f32 to vector<8x32xf32>
    %c0_13 = arith.constant 0 : index
    %c0_14 = arith.constant 0 : index
    %c0_15 = arith.constant 0 : index
    %12 = vector.load %arg6[%c0_13, %c0_14, %c0_15] : memref<4x32x8xbf16, #tpu.memory_space<vmem>>, vector<1x32x8xbf16>
    %13 = vector.shape_cast %12 : vector<1x32x8xbf16> to vector<32x8xbf16>
    %14 = arith.truncf %1 : vector<8x32xf32> to vector<8x32xbf16>
    %cst_16 = arith.constant dense<0.000000e+00> : vector<8x8xf32>
    %15 = tpu.matmul %14, %13, %cst_16 {dimension_numbers = #tpu.dot_dimension_numbers<[1], [0], [0], [1], [0, 0, 1, 1], [], []>} : vector<8x32xbf16>, vector<32x8xbf16>, vector<8x8xf32> -> vector<8x8xf32>
    %c0_17 = arith.constant 0 : index
    %c0_18 = arith.constant 0 : index
    %c0_19 = arith.constant 0 : index
    %16 = vector.load %arg7[%c0_17, %c0_18, %c0_19] : memref<4x1x8xf32, #tpu.memory_space<vmem>>, vector<1x1x8xf32>
    %17 = vector.shape_cast %16 : vector<1x1x8xf32> to vector<1x8xf32>
    %18 = vector.broadcast %17 : vector<1x8xf32> to vector<8x8xf32>
    %19 = arith.addf %15, %18 : vector<8x8xf32>
    %c0_20 = arith.constant 0 : index
    %c0_21 = arith.constant 0 : index
    %c0_22 = arith.constant 0 : index
    %20 = vector.load %arg8[%c0_20, %c0_21, %c0_22] : memref<4x32x8xbf16, #tpu.memory_space<vmem>>, vector<1x32x8xbf16>
    %21 = vector.shape_cast %20 : vector<1x32x8xbf16> to vector<32x8xbf16>
    %22 = arith.truncf %3 : vector<8x32xf32> to vector<8x32xbf16>
    %cst_23 = arith.constant dense<0.000000e+00> : vector<8x8xf32>
    %23 = tpu.matmul %22, %21, %cst_23 {dimension_numbers = #tpu.dot_dimension_numbers<[1], [0], [0], [1], [0, 0, 1, 1], [], []>} : vector<8x32xbf16>, vector<32x8xbf16>, vector<8x8xf32> -> vector<8x8xf32>
    %c0_24 = arith.constant 0 : index
    %c0_25 = arith.constant 0 : index
    %c0_26 = arith.constant 0 : index
    %24 = vector.load %arg9[%c0_24, %c0_25, %c0_26] : memref<4x1x8xf32, #tpu.memory_space<vmem>>, vector<1x1x8xf32>
    %25 = vector.shape_cast %24 : vector<1x1x8xf32> to vector<1x8xf32>
    %26 = vector.broadcast %25 : vector<1x8xf32> to vector<8x8xf32>
    %27 = arith.addf %23, %26 : vector<8x8xf32>
    %c0_27 = arith.constant 0 : index
    %c0_28 = arith.constant 0 : index
    %c0_29 = arith.constant 0 : index
    %28 = vector.load %arg10[%c0_27, %c0_28, %c0_29] : memref<4x32x8xbf16, #tpu.memory_space<vmem>>, vector<1x32x8xbf16>
    %29 = vector.shape_cast %28 : vector<1x32x8xbf16> to vector<32x8xbf16>
    %30 = arith.truncf %5 : vector<8x32xf32> to vector<8x32xbf16>
    %cst_30 = arith.constant dense<0.000000e+00> : vector<8x8xf32>
    %31 = tpu.matmul %30, %29, %cst_30 {dimension_numbers = #tpu.dot_dimension_numbers<[1], [0], [0], [1], [0, 0, 1, 1], [], []>} : vector<8x32xbf16>, vector<32x8xbf16>, vector<8x8xf32> -> vector<8x8xf32>
    %c0_31 = arith.constant 0 : index
    %c0_32 = arith.constant 0 : index
    %c0_33 = arith.constant 0 : index
    %32 = vector.load %arg11[%c0_31, %c0_32, %c0_33] : memref<4x1x8xf32, #tpu.memory_space<vmem>>, vector<1x1x8xf32>
    %33 = vector.shape_cast %32 : vector<1x1x8xf32> to vector<1x8xf32>
    %34 = vector.broadcast %33 : vector<1x8xf32> to vector<8x8xf32>
    %35 = arith.addf %31, %34 : vector<8x8xf32>
    %36 = tpu.transpose %27, [1, 0] : vector<8x8xf32> -> vector<8x8xf32>
    %cst_34 = arith.constant dense<0.000000e+00> : vector<8x8xf32>
    %37 = tpu.matmul %19, %36, %cst_34 {dimension_numbers = #tpu.dot_dimension_numbers<[1], [0], [0], [1], [0, 0, 1, 1], [], []>} : vector<8x8xf32>, vector<8x8xf32>, vector<8x8xf32> -> vector<8x8xf32>
    %cst_35 = arith.constant 0.353553385 : f32
    %38 = vector.broadcast %cst_35 : f32 to vector<8x8xf32>
    %39 = arith.mulf %37, %38 : vector<8x8xf32>
    %40 = arith.addf %39, %10 : vector<8x8xf32>
    %cst_36 = arith.constant dense<0xFF800000> : vector<8xf32>
    %41 = vector.multi_reduction <maximumf>, %40, %cst_36 [1] : vector<8x8xf32> to vector<8xf32>
    %42 = vector.shape_cast %41 : vector<8xf32> to vector<8x1xf32>
    %43 = vector.broadcast %42 : vector<8x1xf32> to vector<8x8xf32>
    %44 = arith.subf %40, %43 : vector<8x8xf32>
    %45 = math.exp %44 : vector<8x8xf32>
    %cst_37 = arith.constant dense<0.000000e+00> : vector<8xf32>
    %46 = vector.multi_reduction <add>, %45, %cst_37 [1] : vector<8x8xf32> to vector<8xf32>
    %47 = vector.shape_cast %46 : vector<8xf32> to vector<8x1xf32>
    %48 = tpu.reciprocal %47 {approx = true} : vector<8x1xf32> -> vector<8x1xf32>
    %49 = vector.broadcast %48 : vector<8x1xf32> to vector<8x8xf32>
    %50 = arith.mulf %45, %49 : vector<8x8xf32>
    %cst_38 = arith.constant dense<0.000000e+00> : vector<8x8xf32>
    %51 = tpu.matmul %50, %35, %cst_38 {dimension_numbers = #tpu.dot_dimension_numbers<[1], [0], [0], [1], [0, 0, 1, 1], [], []>} : vector<8x8xf32>, vector<8x8xf32>, vector<8x8xf32> -> vector<8x8xf32>
    %c0_39 = arith.constant 0 : index
    %c0_40 = arith.constant 0 : index
    %c0_41 = arith.constant 0 : index
    %52 = vector.load %arg12[%c0_39, %c0_40, %c0_41] : memref<4x8x32xbf16, #tpu.memory_space<vmem>>, vector<1x8x32xbf16>
    %53 = vector.shape_cast %52 : vector<1x8x32xbf16> to vector<8x32xbf16>
    %54 = arith.truncf %51 : vector<8x8xf32> to vector<8x8xbf16>
    %cst_42 = arith.constant dense<0.000000e+00> : vector<8x32xf32>
    %55 = tpu.matmul %54, %53, %cst_42 {dimension_numbers = #tpu.dot_dimension_numbers<[1], [0], [0], [1], [0, 0, 1, 1], [], []>} : vector<8x8xbf16>, vector<8x32xbf16>, vector<8x32xf32> -> vector<8x32xf32>
    %56 = arith.addf %11, %55 : vector<8x32xf32>
    %c1 = arith.constant 1 : index
    %c0_43 = arith.constant 0 : index
    %c0_44 = arith.constant 0 : index
    %57 = vector.load %arg6[%c1, %c0_43, %c0_44] : memref<4x32x8xbf16, #tpu.memory_space<vmem>>, vector<1x32x8xbf16>
    %58 = vector.shape_cast %57 : vector<1x32x8xbf16> to vector<32x8xbf16>
    %59 = arith.truncf %1 : vector<8x32xf32> to vector<8x32xbf16>
    %cst_45 = arith.constant dense<0.000000e+00> : vector<8x8xf32>
    %60 = tpu.matmul %59, %58, %cst_45 {dimension_numbers = #tpu.dot_dimension_numbers<[1], [0], [0], [1], [0, 0, 1, 1], [], []>} : vector<8x32xbf16>, vector<32x8xbf16>, vector<8x8xf32> -> vector<8x8xf32>
    %c1_46 = arith.constant 1 : index
    %c0_47 = arith.constant 0 : index
    %c0_48 = arith.constant 0 : index
    %61 = vector.load %arg7[%c1_46, %c0_47, %c0_48] : memref<4x1x8xf32, #tpu.memory_space<vmem>>, vector<1x1x8xf32>
    %62 = vector.shape_cast %61 : vector<1x1x8xf32> to vector<1x8xf32>
    %63 = vector.broadcast %62 : vector<1x8xf32> to vector<8x8xf32>
    %64 = arith.addf %60, %63 : vector<8x8xf32>
    %c1_49 = arith.constant 1 : index
    %c0_50 = arith.constant 0 : index
    %c0_51 = arith.constant 0 : index
    %65 = vector.load %arg8[%c1_49, %c0_50, %c0_51] : memref<4x32x8xbf16, #tpu.memory_space<vmem>>, vector<1x32x8xbf16>
    %66 = vector.shape_cast %65 : vector<1x32x8xbf16> to vector<32x8xbf16>
    %67 = arith.truncf %3 : vector<8x32xf32> to vector<8x32xbf16>
    %cst_52 = arith.constant dense<0.000000e+00> : vector<8x8xf32>
    %68 = tpu.matmul %67, %66, %cst_52 {dimension_numbers = #tpu.dot_dimension_numbers<[1], [0], [0], [1], [0, 0, 1, 1], [], []>} : vector<8x32xbf16>, vector<32x8xbf16>, vector<8x8xf32> -> vector<8x8xf32>
    %c1_53 = arith.constant 1 : index
    %c0_54 = arith.constant 0 : index
    %c0_55 = arith.constant 0 : index
    %69 = vector.load %arg9[%c1_53, %c0_54, %c0_55] : memref<4x1x8xf32, #tpu.memory_space<vmem>>, vector<1x1x8xf32>
    %70 = vector.shape_cast %69 : vector<1x1x8xf32> to vector<1x8xf32>
    %71 = vector.broadcast %70 : vector<1x8xf32> to vector<8x8xf32>
    %72 = arith.addf %68, %71 : vector<8x8xf32>
    %c1_56 = arith.constant 1 : index
    %c0_57 = arith.constant 0 : index
    %c0_58 = arith.constant 0 : index
    %73 = vector.load %arg10[%c1_56, %c0_57, %c0_58] : memref<4x32x8xbf16, #tpu.memory_space<vmem>>, vector<1x32x8xbf16>
    %74 = vector.shape_cast %73 : vector<1x32x8xbf16> to vector<32x8xbf16>
    %75 = arith.truncf %5 : vector<8x32xf32> to vector<8x32xbf16>
    %cst_59 = arith.constant dense<0.000000e+00> : vector<8x8xf32>
    %76 = tpu.matmul %75, %74, %cst_59 {dimension_numbers = #tpu.dot_dimension_numbers<[1], [0], [0], [1], [0, 0, 1, 1], [], []>} : vector<8x32xbf16>, vector<32x8xbf16>, vector<8x8xf32> -> vector<8x8xf32>
    %c1_60 = arith.constant 1 : index
    %c0_61 = arith.constant 0 : index
    %c0_62 = arith.constant 0 : index
    %77 = vector.load %arg11[%c1_60, %c0_61, %c0_62] : memref<4x1x8xf32, #tpu.memory_space<vmem>>, vector<1x1x8xf32>
    %78 = vector.shape_cast %77 : vector<1x1x8xf32> to vector<1x8xf32>
    %79 = vector.broadcast %78 : vector<1x8xf32> to vector<8x8xf32>
    %80 = arith.addf %76, %79 : vector<8x8xf32>
    %81 = tpu.transpose %72, [1, 0] : vector<8x8xf32> -> vector<8x8xf32>
    %cst_63 = arith.constant dense<0.000000e+00> : vector<8x8xf32>
    %82 = tpu.matmul %64, %81, %cst_63 {dimension_numbers = #tpu.dot_dimension_numbers<[1], [0], [0], [1], [0, 0, 1, 1], [], []>} : vector<8x8xf32>, vector<8x8xf32>, vector<8x8xf32> -> vector<8x8xf32>
    %cst_64 = arith.constant 0.353553385 : f32
    %83 = vector.broadcast %cst_64 : f32 to vector<8x8xf32>
    %84 = arith.mulf %82, %83 : vector<8x8xf32>
    %85 = arith.addf %84, %10 : vector<8x8xf32>
    %cst_65 = arith.constant dense<0xFF800000> : vector<8xf32>
    %86 = vector.multi_reduction <maximumf>, %85, %cst_65 [1] : vector<8x8xf32> to vector<8xf32>
    %87 = vector.shape_cast %86 : vector<8xf32> to vector<8x1xf32>
    %88 = vector.broadcast %87 : vector<8x1xf32> to vector<8x8xf32>
    %89 = arith.subf %85, %88 : vector<8x8xf32>
    %90 = math.exp %89 : vector<8x8xf32>
    %cst_66 = arith.constant dense<0.000000e+00> : vector<8xf32>
    %91 = vector.multi_reduction <add>, %90, %cst_66 [1] : vector<8x8xf32> to vector<8xf32>
    %92 = vector.shape_cast %91 : vector<8xf32> to vector<8x1xf32>
    %93 = tpu.reciprocal %92 {approx = true} : vector<8x1xf32> -> vector<8x1xf32>
    %94 = vector.broadcast %93 : vector<8x1xf32> to vector<8x8xf32>
    %95 = arith.mulf %90, %94 : vector<8x8xf32>
    %cst_67 = arith.constant dense<0.000000e+00> : vector<8x8xf32>
    %96 = tpu.matmul %95, %80, %cst_67 {dimension_numbers = #tpu.dot_dimension_numbers<[1], [0], [0], [1], [0, 0, 1, 1], [], []>} : vector<8x8xf32>, vector<8x8xf32>, vector<8x8xf32> -> vector<8x8xf32>
    %c1_68 = arith.constant 1 : index
    %c0_69 = arith.constant 0 : index
    %c0_70 = arith.constant 0 : index
    %97 = vector.load %arg12[%c1_68, %c0_69, %c0_70] : memref<4x8x32xbf16, #tpu.memory_space<vmem>>, vector<1x8x32xbf16>
    %98 = vector.shape_cast %97 : vector<1x8x32xbf16> to vector<8x32xbf16>
    %99 = arith.truncf %96 : vector<8x8xf32> to vector<8x8xbf16>
    %cst_71 = arith.constant dense<0.000000e+00> : vector<8x32xf32>
    %100 = tpu.matmul %99, %98, %cst_71 {dimension_numbers = #tpu.dot_dimension_numbers<[1], [0], [0], [1], [0, 0, 1, 1], [], []>} : vector<8x8xbf16>, vector<8x32xbf16>, vector<8x32xf32> -> vector<8x32xf32>
    %101 = arith.addf %56, %100 : vector<8x32xf32>
    %c2 = arith.constant 2 : index
    %c0_72 = arith.constant 0 : index
    %c0_73 = arith.constant 0 : index
    %102 = vector.load %arg6[%c2, %c0_72, %c0_73] : memref<4x32x8xbf16, #tpu.memory_space<vmem>>, vector<1x32x8xbf16>
    %103 = vector.shape_cast %102 : vector<1x32x8xbf16> to vector<32x8xbf16>
    %104 = arith.truncf %1 : vector<8x32xf32> to vector<8x32xbf16>
    %cst_74 = arith.constant dense<0.000000e+00> : vector<8x8xf32>
    %105 = tpu.matmul %104, %103, %cst_74 {dimension_numbers = #tpu.dot_dimension_numbers<[1], [0], [0], [1], [0, 0, 1, 1], [], []>} : vector<8x32xbf16>, vector<32x8xbf16>, vector<8x8xf32> -> vector<8x8xf32>
    %c2_75 = arith.constant 2 : index
    %c0_76 = arith.constant 0 : index
    %c0_77 = arith.constant 0 : index
    %106 = vector.load %arg7[%c2_75, %c0_76, %c0_77] : memref<4x1x8xf32, #tpu.memory_space<vmem>>, vector<1x1x8xf32>
    %107 = vector.shape_cast %106 : vector<1x1x8xf32> to vector<1x8xf32>
    %108 = vector.broadcast %107 : vector<1x8xf32> to vector<8x8xf32>
    %109 = arith.addf %105, %108 : vector<8x8xf32>
    %c2_78 = arith.constant 2 : index
    %c0_79 = arith.constant 0 : index
    %c0_80 = arith.constant 0 : index
    %110 = vector.load %arg8[%c2_78, %c0_79, %c0_80] : memref<4x32x8xbf16, #tpu.memory_space<vmem>>, vector<1x32x8xbf16>
    %111 = vector.shape_cast %110 : vector<1x32x8xbf16> to vector<32x8xbf16>
    %112 = arith.truncf %3 : vector<8x32xf32> to vector<8x32xbf16>
    %cst_81 = arith.constant dense<0.000000e+00> : vector<8x8xf32>
    %113 = tpu.matmul %112, %111, %cst_81 {dimension_numbers = #tpu.dot_dimension_numbers<[1], [0], [0], [1], [0, 0, 1, 1], [], []>} : vector<8x32xbf16>, vector<32x8xbf16>, vector<8x8xf32> -> vector<8x8xf32>
    %c2_82 = arith.constant 2 : index
    %c0_83 = arith.constant 0 : index
    %c0_84 = arith.constant 0 : index
    %114 = vector.load %arg9[%c2_82, %c0_83, %c0_84] : memref<4x1x8xf32, #tpu.memory_space<vmem>>, vector<1x1x8xf32>
    %115 = vector.shape_cast %114 : vector<1x1x8xf32> to vector<1x8xf32>
    %116 = vector.broadcast %115 : vector<1x8xf32> to vector<8x8xf32>
    %117 = arith.addf %113, %116 : vector<8x8xf32>
    %c2_85 = arith.constant 2 : index
    %c0_86 = arith.constant 0 : index
    %c0_87 = arith.constant 0 : index
    %118 = vector.load %arg10[%c2_85, %c0_86, %c0_87] : memref<4x32x8xbf16, #tpu.memory_space<vmem>>, vector<1x32x8xbf16>
    %119 = vector.shape_cast %118 : vector<1x32x8xbf16> to vector<32x8xbf16>
    %120 = arith.truncf %5 : vector<8x32xf32> to vector<8x32xbf16>
    %cst_88 = arith.constant dense<0.000000e+00> : vector<8x8xf32>
    %121 = tpu.matmul %120, %119, %cst_88 {dimension_numbers = #tpu.dot_dimension_numbers<[1], [0], [0], [1], [0, 0, 1, 1], [], []>} : vector<8x32xbf16>, vector<32x8xbf16>, vector<8x8xf32> -> vector<8x8xf32>
    %c2_89 = arith.constant 2 : index
    %c0_90 = arith.constant 0 : index
    %c0_91 = arith.constant 0 : index
    %122 = vector.load %arg11[%c2_89, %c0_90, %c0_91] : memref<4x1x8xf32, #tpu.memory_space<vmem>>, vector<1x1x8xf32>
    %123 = vector.shape_cast %122 : vector<1x1x8xf32> to vector<1x8xf32>
    %124 = vector.broadcast %123 : vector<1x8xf32> to vector<8x8xf32>
    %125 = arith.addf %121, %124 : vector<8x8xf32>
    %126 = tpu.transpose %117, [1, 0] : vector<8x8xf32> -> vector<8x8xf32>
    %cst_92 = arith.constant dense<0.000000e+00> : vector<8x8xf32>
    %127 = tpu.matmul %109, %126, %cst_92 {dimension_numbers = #tpu.dot_dimension_numbers<[1], [0], [0], [1], [0, 0, 1, 1], [], []>} : vector<8x8xf32>, vector<8x8xf32>, vector<8x8xf32> -> vector<8x8xf32>
    %cst_93 = arith.constant 0.353553385 : f32
    %128 = vector.broadcast %cst_93 : f32 to vector<8x8xf32>
    %129 = arith.mulf %127, %128 : vector<8x8xf32>
    %130 = arith.addf %129, %10 : vector<8x8xf32>
    %cst_94 = arith.constant dense<0xFF800000> : vector<8xf32>
    %131 = vector.multi_reduction <maximumf>, %130, %cst_94 [1] : vector<8x8xf32> to vector<8xf32>
    %132 = vector.shape_cast %131 : vector<8xf32> to vector<8x1xf32>
    %133 = vector.broadcast %132 : vector<8x1xf32> to vector<8x8xf32>
    %134 = arith.subf %130, %133 : vector<8x8xf32>
    %135 = math.exp %134 : vector<8x8xf32>
    %cst_95 = arith.constant dense<0.000000e+00> : vector<8xf32>
    %136 = vector.multi_reduction <add>, %135, %cst_95 [1] : vector<8x8xf32> to vector<8xf32>
    %137 = vector.shape_cast %136 : vector<8xf32> to vector<8x1xf32>
    %138 = tpu.reciprocal %137 {approx = true} : vector<8x1xf32> -> vector<8x1xf32>
    %139 = vector.broadcast %138 : vector<8x1xf32> to vector<8x8xf32>
    %140 = arith.mulf %135, %139 : vector<8x8xf32>
    %cst_96 = arith.constant dense<0.000000e+00> : vector<8x8xf32>
    %141 = tpu.matmul %140, %125, %cst_96 {dimension_numbers = #tpu.dot_dimension_numbers<[1], [0], [0], [1], [0, 0, 1, 1], [], []>} : vector<8x8xf32>, vector<8x8xf32>, vector<8x8xf32> -> vector<8x8xf32>
    %c2_97 = arith.constant 2 : index
    %c0_98 = arith.constant 0 : index
    %c0_99 = arith.constant 0 : index
    %142 = vector.load %arg12[%c2_97, %c0_98, %c0_99] : memref<4x8x32xbf16, #tpu.memory_space<vmem>>, vector<1x8x32xbf16>
    %143 = vector.shape_cast %142 : vector<1x8x32xbf16> to vector<8x32xbf16>
    %144 = arith.truncf %141 : vector<8x8xf32> to vector<8x8xbf16>
    %cst_100 = arith.constant dense<0.000000e+00> : vector<8x32xf32>
    %145 = tpu.matmul %144, %143, %cst_100 {dimension_numbers = #tpu.dot_dimension_numbers<[1], [0], [0], [1], [0, 0, 1, 1], [], []>} : vector<8x8xbf16>, vector<8x32xbf16>, vector<8x32xf32> -> vector<8x32xf32>
    %146 = arith.addf %101, %145 : vector<8x32xf32>
    %c3 = arith.constant 3 : index
    %c0_101 = arith.constant 0 : index
    %c0_102 = arith.constant 0 : index
    %147 = vector.load %arg6[%c3, %c0_101, %c0_102] : memref<4x32x8xbf16, #tpu.memory_space<vmem>>, vector<1x32x8xbf16>
    %148 = vector.shape_cast %147 : vector<1x32x8xbf16> to vector<32x8xbf16>
    %149 = arith.truncf %1 : vector<8x32xf32> to vector<8x32xbf16>
    %cst_103 = arith.constant dense<0.000000e+00> : vector<8x8xf32>
    %150 = tpu.matmul %149, %148, %cst_103 {dimension_numbers = #tpu.dot_dimension_numbers<[1], [0], [0], [1], [0, 0, 1, 1], [], []>} : vector<8x32xbf16>, vector<32x8xbf16>, vector<8x8xf32> -> vector<8x8xf32>
    %c3_104 = arith.constant 3 : index
    %c0_105 = arith.constant 0 : index
    %c0_106 = arith.constant 0 : index
    %151 = vector.load %arg7[%c3_104, %c0_105, %c0_106] : memref<4x1x8xf32, #tpu.memory_space<vmem>>, vector<1x1x8xf32>
    %152 = vector.shape_cast %151 : vector<1x1x8xf32> to vector<1x8xf32>
    %153 = vector.broadcast %152 : vector<1x8xf32> to vector<8x8xf32>
    %154 = arith.addf %150, %153 : vector<8x8xf32>
    %c3_107 = arith.constant 3 : index
    %c0_108 = arith.constant 0 : index
    %c0_109 = arith.constant 0 : index
    %155 = vector.load %arg8[%c3_107, %c0_108, %c0_109] : memref<4x32x8xbf16, #tpu.memory_space<vmem>>, vector<1x32x8xbf16>
    %156 = vector.shape_cast %155 : vector<1x32x8xbf16> to vector<32x8xbf16>
    %157 = arith.truncf %3 : vector<8x32xf32> to vector<8x32xbf16>
    %cst_110 = arith.constant dense<0.000000e+00> : vector<8x8xf32>
    %158 = tpu.matmul %157, %156, %cst_110 {dimension_numbers = #tpu.dot_dimension_numbers<[1], [0], [0], [1], [0, 0, 1, 1], [], []>} : vector<8x32xbf16>, vector<32x8xbf16>, vector<8x8xf32> -> vector<8x8xf32>
    %c3_111 = arith.constant 3 : index
    %c0_112 = arith.constant 0 : index
    %c0_113 = arith.constant 0 : index
    %159 = vector.load %arg9[%c3_111, %c0_112, %c0_113] : memref<4x1x8xf32, #tpu.memory_space<vmem>>, vector<1x1x8xf32>
    %160 = vector.shape_cast %159 : vector<1x1x8xf32> to vector<1x8xf32>
    %161 = vector.broadcast %160 : vector<1x8xf32> to vector<8x8xf32>
    %162 = arith.addf %158, %161 : vector<8x8xf32>
    %c3_114 = arith.constant 3 : index
    %c0_115 = arith.constant 0 : index
    %c0_116 = arith.constant 0 : index
    %163 = vector.load %arg10[%c3_114, %c0_115, %c0_116] : memref<4x32x8xbf16, #tpu.memory_space<vmem>>, vector<1x32x8xbf16>
    %164 = vector.shape_cast %163 : vector<1x32x8xbf16> to vector<32x8xbf16>
    %165 = arith.truncf %5 : vector<8x32xf32> to vector<8x32xbf16>
    %cst_117 = arith.constant dense<0.000000e+00> : vector<8x8xf32>
    %166 = tpu.matmul %165, %164, %cst_117 {dimension_numbers = #tpu.dot_dimension_numbers<[1], [0], [0], [1], [0, 0, 1, 1], [], []>} : vector<8x32xbf16>, vector<32x8xbf16>, vector<8x8xf32> -> vector<8x8xf32>
    %c3_118 = arith.constant 3 : index
    %c0_119 = arith.constant 0 : index
    %c0_120 = arith.constant 0 : index
    %167 = vector.load %arg11[%c3_118, %c0_119, %c0_120] : memref<4x1x8xf32, #tpu.memory_space<vmem>>, vector<1x1x8xf32>
    %168 = vector.shape_cast %167 : vector<1x1x8xf32> to vector<1x8xf32>
    %169 = vector.broadcast %168 : vector<1x8xf32> to vector<8x8xf32>
    %170 = arith.addf %166, %169 : vector<8x8xf32>
    %171 = tpu.transpose %162, [1, 0] : vector<8x8xf32> -> vector<8x8xf32>
    %cst_121 = arith.constant dense<0.000000e+00> : vector<8x8xf32>
    %172 = tpu.matmul %154, %171, %cst_121 {dimension_numbers = #tpu.dot_dimension_numbers<[1], [0], [0], [1], [0, 0, 1, 1], [], []>} : vector<8x8xf32>, vector<8x8xf32>, vector<8x8xf32> -> vector<8x8xf32>
    %cst_122 = arith.constant 0.353553385 : f32
    %173 = vector.broadcast %cst_122 : f32 to vector<8x8xf32>
    %174 = arith.mulf %172, %173 : vector<8x8xf32>
    %175 = arith.addf %174, %10 : vector<8x8xf32>
    %cst_123 = arith.constant dense<0xFF800000> : vector<8xf32>
    %176 = vector.multi_reduction <maximumf>, %175, %cst_123 [1] : vector<8x8xf32> to vector<8xf32>
    %177 = vector.shape_cast %176 : vector<8xf32> to vector<8x1xf32>
    %178 = vector.broadcast %177 : vector<8x1xf32> to vector<8x8xf32>
    %179 = arith.subf %175, %178 : vector<8x8xf32>
    %180 = math.exp %179 : vector<8x8xf32>
    %cst_124 = arith.constant dense<0.000000e+00> : vector<8xf32>
    %181 = vector.multi_reduction <add>, %180, %cst_124 [1] : vector<8x8xf32> to vector<8xf32>
    %182 = vector.shape_cast %181 : vector<8xf32> to vector<8x1xf32>
    %183 = tpu.reciprocal %182 {approx = true} : vector<8x1xf32> -> vector<8x1xf32>
    %184 = vector.broadcast %183 : vector<8x1xf32> to vector<8x8xf32>
    %185 = arith.mulf %180, %184 : vector<8x8xf32>
    %cst_125 = arith.constant dense<0.000000e+00> : vector<8x8xf32>
    %186 = tpu.matmul %185, %170, %cst_125 {dimension_numbers = #tpu.dot_dimension_numbers<[1], [0], [0], [1], [0, 0, 1, 1], [], []>} : vector<8x8xf32>, vector<8x8xf32>, vector<8x8xf32> -> vector<8x8xf32>
    %c3_126 = arith.constant 3 : index
    %c0_127 = arith.constant 0 : index
    %c0_128 = arith.constant 0 : index
    %187 = vector.load %arg12[%c3_126, %c0_127, %c0_128] : memref<4x8x32xbf16, #tpu.memory_space<vmem>>, vector<1x8x32xbf16>
    %188 = vector.shape_cast %187 : vector<1x8x32xbf16> to vector<8x32xbf16>
    %189 = arith.truncf %186 : vector<8x8xf32> to vector<8x8xbf16>
    %cst_129 = arith.constant dense<0.000000e+00> : vector<8x32xf32>
    %190 = tpu.matmul %189, %188, %cst_129 {dimension_numbers = #tpu.dot_dimension_numbers<[1], [0], [0], [1], [0, 0, 1, 1], [], []>} : vector<8x8xbf16>, vector<8x32xbf16>, vector<8x32xf32> -> vector<8x32xf32>
    %191 = arith.addf %146, %190 : vector<8x32xf32>
    %c0_130 = arith.constant 0 : index
    %c0_131 = arith.constant 0 : index
    %192 = vector.load %arg13[%c0_130, %c0_131] : memref<1x32xf32, #tpu.memory_space<vmem>>, vector<1x32xf32>
    %193 = vector.broadcast %192 : vector<1x32xf32> to vector<8x32xf32>
    %194 = arith.addf %191, %193 : vector<8x32xf32>
    %195 = arith.addf %1, %194 : vector<8x32xf32>
    %cst_132 = arith.constant dense<0.000000e+00> : vector<8xf32>
    %196 = vector.multi_reduction <add>, %195, %cst_132 [1] : vector<8x32xf32> to vector<8xf32>
    %197 = vector.shape_cast %196 : vector<8xf32> to vector<8x1xf32>
    %cst_133 = arith.constant 3.200000e+01 : f32
    %198 = vector.broadcast %cst_133 : f32 to vector<8x1xf32>
    %199 = arith.divf %197, %198 : vector<8x1xf32>
    %200 = vector.broadcast %199 : vector<8x1xf32> to vector<8x32xf32>
    %201 = arith.subf %195, %200 : vector<8x32xf32>
    %202 = arith.mulf %201, %201 : vector<8x32xf32>
    %cst_134 = arith.constant dense<0.000000e+00> : vector<8xf32>
    %203 = vector.multi_reduction <add>, %202, %cst_134 [1] : vector<8x32xf32> to vector<8xf32>
    %204 = vector.shape_cast %203 : vector<8xf32> to vector<8x1xf32>
    %cst_135 = arith.constant 3.200000e+01 : f32
    %205 = vector.broadcast %cst_135 : f32 to vector<8x1xf32>
    %206 = arith.divf %204, %205 : vector<8x1xf32>
    %207 = vector.broadcast %199 : vector<8x1xf32> to vector<8x32xf32>
    %208 = arith.subf %195, %207 : vector<8x32xf32>
    %cst_136 = arith.constant 9.99999974E-6 : f32
    %209 = vector.broadcast %cst_136 : f32 to vector<8x1xf32>
    %210 = arith.addf %206, %209 : vector<8x1xf32>
    %211 = math.rsqrt %210 : vector<8x1xf32>
    %212 = vector.broadcast %211 : vector<8x1xf32> to vector<8x32xf32>
    %213 = arith.mulf %208, %212 : vector<8x32xf32>
    %c0_137 = arith.constant 0 : index
    %c0_138 = arith.constant 0 : index
    %214 = vector.load %arg14[%c0_137, %c0_138] : memref<1x32xf32, #tpu.memory_space<vmem>>, vector<1x32xf32>
    %215 = vector.broadcast %214 : vector<1x32xf32> to vector<8x32xf32>
    %216 = arith.mulf %213, %215 : vector<8x32xf32>
    %c0_139 = arith.constant 0 : index
    %c0_140 = arith.constant 0 : index
    %217 = vector.load %arg15[%c0_139, %c0_140] : memref<1x32xf32, #tpu.memory_space<vmem>>, vector<1x32xf32>
    %218 = vector.broadcast %217 : vector<1x32xf32> to vector<8x32xf32>
    %219 = arith.addf %216, %218 : vector<8x32xf32>
    %c0_141 = arith.constant 0 : index
    %c0_142 = arith.constant 0 : index
    %c0_143 = arith.constant 0 : index
    %220 = vector.load %arg16[%c0_141, %c0_142, %c0_143] : memref<1x8x32xf32, #tpu.memory_space<vmem>>, vector<1x8x32xf32>
    %221 = vector.shape_cast %220 : vector<1x8x32xf32> to vector<8x32xf32>
    %222 = vector.shape_cast %219 : vector<8x32xf32> to vector<1x8x32xf32>
    tpu.vector_store %arg16[%c0_141, %c0_142, %c0_143], %222 {strides = array<i32>} : memref<1x8x32xf32, #tpu.memory_space<vmem>>, vector<1x8x32xf32>,
    return
  }
  func.func @transform_0(%arg0: i32) -> (i32, i32, i32) {
    %c0_i32 = arith.constant 0 : i32
    %c0_i32_0 = arith.constant 0 : i32
    %c0_i32_1 = arith.constant 0 : i32
    return %arg0, %c0_i32, %c0_i32_0 : i32, i32, i32
  }
  func.func @transform_1(%arg0: i32) -> (i32, i32, i32) {
    %c0_i32 = arith.constant 0 : i32
    %c0_i32_0 = arith.constant 0 : i32
    %c0_i32_1 = arith.constant 0 : i32
    return %arg0, %c0_i32, %c0_i32_0 : i32, i32, i32
  }
  func.func @transform_2(%arg0: i32) -> (i32, i32, i32) {
    %c0_i32 = arith.constant 0 : i32
    %c0_i32_0 = arith.constant 0 : i32
    %c0_i32_1 = arith.constant 0 : i32
    return %arg0, %c0_i32, %c0_i32_0 : i32, i32, i32
  }
  func.func @transform_3(%arg0: i32) -> (i32, i32) {
    %c0_i32 = arith.constant 0 : i32
    %c0_i32_0 = arith.constant 0 : i32
    %c0_i32_1 = arith.constant 0 : i32
    return %c0_i32, %c0_i32_0 : i32, i32
  }
  func.func @transform_4(%arg0: i32) -> (i32, i32, i32) {
    %c0_i32 = arith.constant 0 : i32
    %c0_i32_0 = arith.constant 0 : i32
    %c0_i32_1 = arith.constant 0 : i32
    return %arg0, %c0_i32, %c0_i32_0 : i32, i32, i32
  }
  func.func @transform_5(%arg0: i32) -> (i32, i32, i32) {
    %c0_i32 = arith.constant 0 : i32
    %c0_i32_0 = arith.constant 0 : i32
    %c0_i32_1 = arith.constant 0 : i32
    %c0_i32_2 = arith.constant 0 : i32
    return %c0_i32, %c0_i32_0, %c0_i32_1 : i32, i32, i32
  }
  func.func @transform_6(%arg0: i32) -> (i32, i32, i32) {
    %c0_i32 = arith.constant 0 : i32
    %c0_i32_0 = arith.constant 0 : i32
    %c0_i32_1 = arith.constant 0 : i32
    %c0_i32_2 = arith.constant 0 : i32
    return %c0_i32, %c0_i32_0, %c0_i32_1 : i32, i32, i32
  }
  func.func @transform_7(%arg0: i32) -> (i32, i32, i32) {
    %c0_i32 = arith.constant 0 : i32
    %c0_i32_0 = arith.constant 0 : i32
    %c0_i32_1 = arith.constant 0 : i32
    %c0_i32_2 = arith.constant 0 : i32
    return %c0_i32, %c0_i32_0, %c0_i32_1 : i32, i32, i32
  }
  func.func @transform_8(%arg0: i32) -> (i32, i32, i32) {
    %c0_i32 = arith.constant 0 : i32
    %c0_i32_0 = arith.constant 0 : i32
    %c0_i32_1 = arith.constant 0 : i32
    %c0_i32_2 = arith.constant 0 : i32
    return %c0_i32, %c0_i32_0, %c0_i32_1 : i32, i32, i32
  }
  func.func @transform_9(%arg0: i32) -> (i32, i32, i32) {
    %c0_i32 = arith.constant 0 : i32
    %c0_i32_0 = arith.constant 0 : i32
    %c0_i32_1 = arith.constant 0 : i32
    %c0_i32_2 = arith.constant 0 : i32
    return %c0_i32, %c0_i32_0, %c0_i32_1 : i32, i32, i32
  }
  func.func @transform_10(%arg0: i32) -> (i32, i32, i32) {
    %c0_i32 = arith.constant 0 : i32
    %c0_i32_0 = arith.constant 0 : i32
    %c0_i32_1 = arith.constant 0 : i32
    %c0_i32_2 = arith.constant 0 : i32
    return %c0_i32, %c0_i32_0, %c0_i32_1 : i32, i32, i32
  }
  func.func @transform_11(%arg0: i32) -> (i32, i32, i32) {
    %c0_i32 = arith.constant 0 : i32
    %c0_i32_0 = arith.constant 0 : i32
    %c0_i32_1 = arith.constant 0 : i32
    %c0_i32_2 = arith.constant 0 : i32
    return %c0_i32, %c0_i32_0, %c0_i32_1 : i32, i32, i32
  }
  func.func @transform_12(%arg0: i32) -> (i32, i32) {
    %c0_i32 = arith.constant 0 : i32
    %c0_i32_0 = arith.constant 0 : i32
    %c0_i32_1 = arith.constant 0 : i32
    return %c0_i32, %c0_i32_0 : i32, i32
  }
  func.func @transform_13(%arg0: i32) -> (i32, i32) {
    %c0_i32 = arith.constant 0 : i32
    %c0_i32_0 = arith.constant 0 : i32
    %c0_i32_1 = arith.constant 0 : i32
    return %c0_i32, %c0_i32_0 : i32, i32
  }
  func.func @transform_14(%arg0: i32) -> (i32, i32) {
    %c0_i32 = arith.constant 0 : i32
    %c0_i32_0 = arith.constant 0 : i32
    %c0_i32_1 = arith.constant 0 : i32
    return %c0_i32, %c0_i32_0 : i32, i32
  }
  func.func @transform_15(%arg0: i32) -> (i32, i32, i32) {
    %c0_i32 = arith.constant 0 : i32
    %c0_i32_0 = arith.constant 0 : i32
    %c0_i32_1 = arith.constant 0 : i32
    return %arg0, %c0_i32, %c0_i32_0 : i32, i32, i32
  }
}

</mosaic_0001>

<bundles_post_ra>
// kernel: tpu_custom_call.1
= control target key start
LH: loop header
LB: loop body
LE: loop exit
PB: predicated region body
PF: predicated region fallthrough
CT: control target
= control target key end

     0   :  { %s2202_s0 = inlined_call_operand.vmem [shape: f32[2,8,32], index: 0, kind: input, shape index: {}]   ;;  %s2203_s1 = inlined_call_operand.vmem [shape: f32[2,8,32], index: 1, kind: input, shape index: {}]   ;;  %s2204_s2 = inlined_call_operand.vmem [shape: f32[2,8,32], index: 2, kind: input, shape index: {}]   ;;  %s2205_s3 = inlined_call_operand.vmem [shape: f32[8,8], index: 3, kind: input, shape index: {}]   ;;  %s2206_s4 = inlined_call_operand.vmem [shape: f32[2,1,8], index: 4, kind: input, shape index: {}]   ;;  %s2207_s5 = inlined_call_operand.vmem [shape: bf16[4,32,8], index: 5, kind: input, shape index: {}]   ;;  %s2208_s6 = inlined_call_operand.vmem [shape: f32[4,1,8], index: 6, kind: input, shape index: {}]   ;;  %s2209_s7 = inlined_call_operand.vmem [shape: bf16[4,32,8], index: 7, kind: input, shape index: {}]   ;;  %s2210_s8 = inlined_call_operand.vmem [shape: f32[4,1,8], index: 8, kind: input, shape index: {}]   ;;  %s2211_s9 = inlined_call_operand.vmem [shape: bf16[4,32,8], index: 9, kind: input, shape index: {}]   ;;  %s2212_s10 = inlined_call_operand.vmem [shape: f32[4,1,8], index: 10, kind: input, shape index: {}]   ;;  %s2213_s11 = inlined_call_operand.vmem [shape: bf16[4,8,32], index: 11, kind: input, shape index: {}]   ;;  %s2214_s12 = inlined_call_operand.vmem [shape: f32[1,32], index: 12, kind: input, shape index: {}]   ;;  %s2215_s13 = inlined_call_operand.vmem [shape: f32[1,32], index: 13, kind: input, shape index: {}]   ;;  %s2216_s14 = inlined_call_operand.vmem [shape: f32[1,32], index: 14, kind: input, shape index: {}]   ;;  %s2217_s15 = inlined_call_operand.hbm [shape: f32[2,8,32], index: 15, kind: output, shape index: {}]  }
   0x1   :  { %2224 = sst [smem:[#allocation11_spill]] %s2202_s0 }
   0x2   :  { %20 = vsyncpa [#allocation3], 0 }
   0x3   :  { %22 = vsyncpa [#allocation3 + $0x1], 0  ;;  %s1897_s18 = smov 0   ;;  %s1899_s19 = smov 0  }
   0x4   :  { %s1901_s20 = smov 0   ;;  %s1903_s21 = smov 0  }
   0x5 LB: > { %2225 = sst [smem:[#allocation5_spill]] %s1802_s18  ;;  %s1918_s22 = sadd.s32 4294967295, %s1814_s21   ;;  %s1814_s21 = sphi %s1903_s21, %s2237_s21   ;;  %s1810_s20 = sphi %s1901_s20, %s2239_s20   ;;  %s1806_s19 = sphi %s1899_s19, %s2241_s19   ;;  %s1802_s18 = sphi %s1897_s18, %s2240_s18  }
   0x6   : > { %2226 = sst [smem:[#allocation6_spill]] %s1810_s20  ;;  %s1468_s23 = sadd.s32 4294967294, %s1814_s21  }
   0x7   : > { %2227 = sst [smem:[#allocation7_spill]] %s1814_s21  ;;  %s1922_s24 = sadd.s32 1, %s1814_s21  }
   0x8   : > { %2228 = sst [smem:[#allocation8_spill]] %s1922_s24  ;;  %s370_s25 = sadd.s32 1, %s1810_s20 }
   0x9   : > { %s367_s26 = ssub.s32 %s1814_s21, %s1922_s24  ;;  %p380_p0 = scmp.ne.s32.totalorder %s1810_s20, %s1806_s19 }
   0xa   : > { %p368_p1 = scmp.eq.s32.totalorder %s367_s26, 0  ;;  %p381_p2 = scmp.eq.s32.totalorder %s1918_s22, 1 }
   0xb   : > { %p386_p3 = scmp.ne.s32.totalorder %s1806_s19, %s1802_s18  ;;  %p387_p4 = scmp.eq.s32.totalorder %s1468_s23, 1 }
   0xc   : > { %s1933_s27 = scalar_select %p368_p1, %s1810_s20, %s370_s25  }
   0xd   : > { %p1935_p5 = por %p381_p2, %p380_p0  ;;  %p1939_p6 = por %p387_p4, %p386_p3 }
   0xe   : > { %2229 = sst [smem:[#allocation9_spill]] %s1933_s27  ;;  %p1471_p7 = scmp.ge.s32.totalorder %s1814_s21, 1 }
   0xf   : > { %s2231_s29 = scalar_select %p1939_p6, 1, 0 }
  0x10   : > { %p465_p8 = scmp.lt.s32.totalorder %s1814_s21, 3 }
  0x11   : > { %2232 = sst [smem:[#allocation10_spill]] %s2231_s29 }
  0x12   : > { %p466_p9 = pnand %p1471_p7, %p465_p8 }
  0x13   : > { %p523_p10 = scmp.lt.s32.totalorder (!%p466_p9), %s1918_s22, 1  ;;  %s2233_s0 = sld [smem:[#allocation11_spill]] (!%p466_p9) }
  0x14   : > { %469 = sbr.rel (%p466_p9) target bundleno = 2687 (0xa7f), region = 80  ;;  %s520_s18 = sand.u32 (!%p466_p9), 1, %s1806_s19  }
  0x15   : > { %s1472_s20 = sshll.u32 (!%p466_p9), %s520_s18, 3  ;;  %s1649_s27 = sshll.u32 (!%p466_p9), %s1918_s22, 3 }
  0x16   : > { %s1371_s25 = scalar_lea.hbm (!%p466_p9), %s2217_s15, %s1649_s27  ;;  %s1361_s29 = scalar_lea.sflag (!%p466_p9), [#allocation3], %s520_s18 }
  0x19   : > { %v1653_v0 = vld [vmem:[%s2207_s5 + $0x8] sm:$0xff]  ;;  %v1652_v2 = vld [vmem:[%s2207_s5] sm:$0xff]  ;;  %s1959_s24 = scalar_select %p523_p10, %s1918_s22, 1  ;;  %vm569_vm0 = vcmask 261120   ;;  %vm660_vm1 = vcmask 64512   ;;  %v1661_v36 = vld [vmem:[%s2209_s7 + $0x18] sm:$0xff] }
  0x1a   : > { %v1655_v1 = vld [vmem:[%s2209_s7 + $0x8] sm:$0xff]  ;;  %579 = vmatpush.bf16.msra.mxu0 %v1653_v0  ;;  %v1654_v3 = vld [vmem:[%s2209_s7] sm:$0xff]  ;;  %v1660_v37 = vld [vmem:[%s2209_s7 + $0x10] sm:$0xff]  ;;  %vm898_vm2 = vcmask 1043456  }
  0x1b   : > { %616 = vmatpush.bf16.msra.mxu1 %v1655_v1  ;;  %s1473_s30 = sshll.u32 %s1959_s24, 3  ;;  %v1717_v8 = vld [vmem:[%s2210_s8] ss:$0 sm:$0xff]  ;;  %s537_s26 = scalar_lea.vmem %s2206_s4, %s1959_s24  ;;  %v1657_v16 = vld [vmem:[%s2211_s9 + $0x8] sm:$0xff]  ;;  %v1659_v38 = vld [vmem:[%s2207_s5 + $0x18] sm:$0xff] }
  0x1c   : > { %s526_s17 = scalar_lea.vmem %s2233_s0, %s1473_s30  ;;  %s530_s21 = scalar_lea.vmem %s2203_s1, %s1473_s30  ;;  %v1716_v9 = vld [vmem:[%s2208_s6] ss:$0 sm:$0xff]  ;;  %653 = vmatpush.bf16.msra.mxu2 %v1657_v16  ;;  %v1658_v39 = vld [vmem:[%s2207_s5 + $0x10] sm:$0xff]  ;;  %v1720_v43 = vld [vmem:[%s2210_s8 + $0x1] ss:$0 sm:$0xff] }
  0x1d   : > { %v1968_v4 = vld [vmem:[%s526_s17] sm:$0xff]  ;;  %s534_s23 = scalar_lea.vmem %s2204_s2, %s1473_s30  ;;  %v1663_v55 = vld [vmem:[%s2211_s9 + $0x18] sm:$0xff]  ;;  %v1662_v56 = vld [vmem:[%s2211_s9 + $0x10] sm:$0xff]  ;;  %s522_s17 = scalar_lea.vmem [#allocation2], %s1472_s20 }
  0x1e   : > { %580 = vmatpush.bf16.msra.mxu0 %v1652_v2  ;;  %v540_v5 = vld [vmem:[%s530_s21] sm:$0xff]  ;;  %v1972_v6 = vpack.c.bf16 %v1968_v4, %v1968_v4  ;;  %s1373_s22 = sshll.u32 %s522_s17, 4  ;;  %s1772_s20 = scalar_lea.hbm %s2217_s15, 16  ;;  %s1374_s22 = int_to_ptr.vmem [resolvable:$true] %s1373_s22 }
  0x1f   : > { %617 = vmatpush.bf16.msra.mxu1 %v1654_v3  ;;  %v1974_v7 = vpack.c.bf16 %v540_v5, %v540_v5  ;;  %v1656_v17 = vld [vmem:[%s2211_s9] sm:$0xff] }
  0x20   : > { %v541_v18 = vld [vmem:[%s534_s23] sm:$0xff]  ;;  %654 = vmatpush.bf16.msra.mxu2 %v1656_v17  ;;  %s1375_s23 = sshll.u32 %s1371_s25, 4  ;;  %s1376_s23 = int_to_ptr.hbm [resolvable:$true] %s1375_s23 }
  0x21   : > { %1484 = vmatmul.msk.bf16.vlgmr.msra.gmra.mxu0 %vm569_vm0, %v1972_v6  ;;  %v2001_v19 = vpack.c.bf16 %v541_v18, %v541_v18  ;;  %v1718_v20 = vld [vmem:[%s537_s26] ss:$0 sm:$0xff]  ;;  %v1721_v51 = vld [vmem:[%s2208_s6 + $0x1] ss:$0 sm:$0xff]  ;;  %v1551_v18 = vld [vmem:[%s2213_s11 + $0x4] sm:$0xf] }
  0x22   : > { %1493 = vmatmul.msk.bf16.vlgmr.msra.gmra.mxu1 %vm569_vm0, %v1974_v7  ;;  %v542_v21 = vld [vmem:[%s2205_s3] sm:$0xff]  ;;  %788 = vmatpush.bf16.msrb.mxu0 %v1661_v36  ;;  %s1766_s24 = sshra.s32 %s1376_s23, 4  ;;  %s1767_s24 = int_to_ptr.hbm [resolvable:$true] %s1766_s24 }
  0x23   : > { %1502 = vmatmul.msk.bf16.vlgmr.msra.gmra.mxu2 %vm569_vm0, %v2001_v19  ;;  %v2008_v22 = vadd.f32 %v1718_v20, %v542_v21  ;;  %v1719_v27 = vld [vmem:[%s2212_s10] ss:$0 sm:$0xff]  ;;  %823 = vmatpush.bf16.msrb.mxu1 %v1663_v55  ;;  %v1722_v63 = vld [vmem:[%s2212_s10 + $0x1] ss:$0 sm:$0xff]  ;;  %v900_v20 = vsel %vm898_vm2, %v1551_v18, 0  ;;  %s1768_s27 = scalar_lea.hbm %s1767_s24, 8  ;;  %p1773_p0 = scmp.lt.s32.totalorder %s1767_s24, %s2217_s15 }
  0x24   : > { %v723_v46 = vld [vmem:[%s2213_s11] sm:$0xf]  ;;  %p1769_p11 = scmp.ne.s32.totalorder %s1767_s24, %s1768_s27  ;;  %p1774_p1 = scmp.lt.s32.totalorder %s1772_s20, %s1768_s27 }
  0x25   : > { %v919_v47 = vsel %vm898_vm2, %v723_v46, 0 }
  0x26   : > { %789 = vmatpush.bf16.msrb.mxu0 %v1660_v37  ;;  %p1770_p12 = pnand %p1769_p11, %p1935_p5  ;;  %p1775_p2 = por %p1774_p1, %p1773_p0 }
  0x27   : > { %824 = vmatpush.bf16.msrb.mxu1 %v1662_v56  ;;  %v1599_v56 = vld [vmem:[%s2213_s11 + $0x8] sm:$0xf] }
  0x28   : > { %p1771_p13 = pneg %p1770_p12 }
  0x2a   : > { %928 = vmatpush.bf16.msra.mxu0 %v919_v47  ;;  %p1776_p3 = pnand %p1775_p2, %p1771_p13 }
  0x31   : > { %1533 = vmatmul.msk.bf16.vlgmr.msrb.gmra.mxu0 %vm569_vm0, %v1974_v7 }
  0x32   : > { %1547 = vmatmul.msk.bf16.vlgmr.msrb.gmra.mxu1 %vm569_vm0, %v2001_v19 }
  0x9e   : > { %v582_v10 = vpop.f32.mrf.mxu0 }
  0x9f   : > { %v619_v11 = vpop.f32.mrf.mxu1  ;;  %v583_v13 = vadd.f32 %v1716_v9, %v582_v10 }
  0xa0   : > { %v620_v12 = vadd.f32 %v1717_v8, %v619_v11  ;;  %v1667_v11 = vld [vmem:[%s2209_s7 + $0x28] sm:$0xff] }
  0xa2   : > { %1503 = vmatpush.xpose.msk.msra.mxu3 %vm660_vm1, %v620_v12  ;;  %v1665_v12 = vld [vmem:[%s2207_s5 + $0x28] sm:$0xff] }
  0xa3   : > { %962 = vmatpush.bf16.msra.mxu1 %v1665_v12 }
  0xa5   : > { %1504 = vmatmul.msk.f32.vlgmr.msra.gmra.mxu3 %vm660_vm1, %v583_v13  ;;  %v1666_v13 = vld [vmem:[%s2209_s7 + $0x20] sm:$0xff] }
  0xa6   : > { %v584_v14 = vpop.f32.mrf.mxu0  ;;  %v656_v28 = vpop.f32.mrf.mxu2 }
  0xa7   : > { %v621_v15 = vpop.f32.mrf.mxu1  ;;  %v657_v29 = vadd.f32 %v1719_v27, %v656_v28  ;;  %v1664_v14 = vld [vmem:[%s2207_s5 + $0x20] sm:$0xff] }
  0xa8   : > { %963 = vmatpush.bf16.msra.mxu1 %v1664_v14  ;;  %v1724_v27 = vld [vmem:[%s2208_s6 + $0x2] ss:$0 sm:$0xff] }
  0xa9   : > { %718 = vmatpush.msrb.mxu3 %v657_v29 }
  0xab   : > { %753 = vmatpush.bf16.msra.mxu3 %v1659_v38  ;;  %1567 = vmatmul.msk.bf16.vlgmr.msra.gmra.mxu1 %vm569_vm0, %v1972_v6 }
  0xae   : > { %v658_v32 = vpop.f32.mrf.mxu2  ;;  %v791_v44 = vpop.f32.mrf.mxu0 }
  0xaf   : > { %754 = vmatpush.bf16.msra.mxu3 %v1658_v39  ;;  %v792_v45 = vadd.f32 %v1720_v43, %v791_v44  ;;  %v826_v0 = vpop.f32.mrf.mxu1  ;;  %v1669_v32 = vld [vmem:[%s2211_s9 + $0x28] sm:$0xff] }
  0xb0   : > { %v827_v1 = vadd.f32 %v1722_v63, %v826_v0 }
  0xb1   : > { %1548 = vmatpush.xpose.msk.msrb.mxu2 %vm660_vm1, %v792_v45 }
  0xb5   : > { %887 = vmatpush.msra.mxu2 %v827_v1  ;;  %v1727_v1 = vld [vmem:[%s2208_s6 + $0x3] ss:$0 sm:$0xff] }
  0xb6   : > { %v793_v48 = vpop.f32.mrf.mxu0 }
  0xb7   : > { %v828_v2 = vpop.f32.mrf.mxu1 }
 0x128   : > { %v684_v23 = vpop.f32.mrf.mxu3  ;;  %v965_v21 = vpop.f32.mrf.mxu1 }
 0x129   : > { %v687_v24 = vmul.f32 0.35355338, %v684_v23 }
 0x12b   : > { %v688_v25 = vadd.f32 %v687_v24, %v2008_v22 }
 0x12d   : > { %v689_v26 = vsel %vm660_vm1, %v688_v25, -inf }
 0x12e   : > { %690 = vmax.xlane.f32.xlu0 %v689_v26  ;;  %v1723_v26 = vld [vmem:[%s2210_s8 + $0x2] ss:$0 sm:$0xff] }
 0x130   : > { %v967_v23 = vpop.f32.mrf.mxu1 }
 0x1a1   : > { %v691_v30 = vpop.xlane.xlu0 %690 }
 0x1a2   : > { %v692_v31 = vsub.f32 %v688_v25, %v691_v30  ;;  %v966_v30 = vadd.f32 %v1724_v27, %v965_v21  ;;  %v1646_v27 = vld [vmem:[%s2213_s11 + $0xc] sm:$0xf] }
 0x1a4   : > { %v693_v33 = vmul.f32 1.442695, %v692_v31 }
 0x1a6   : > { %1732 = vpow2.f32 %v693_v33  ;;  %v1668_v33 = vld [vmem:[%s2211_s9 + $0x20] sm:$0xff] }
 0x1ac   : > { %v1733_v34 = vpop.eup %1732 }
 0x1ad   : > { %v695_v35 = vsel %vm660_vm1, %v1733_v34, 0.0 }
 0x1ae   : > { %696 = vadd.xlane.f32.xlu0 %v695_v35 }
 0x221   : > { %v697_v40 = vpop.xlane.xlu0 %696 }
 0x222   : > { %1734 = vrcp.f32 %v697_v40  ;;  %v1725_v40 = vld [vmem:[%s2212_s10 + $0x2] ss:$0 sm:$0xff] }
 0x228   : > { %v1735_v41 = vpop.eup %1734 }
 0x229   : > { %v699_v42 = vmul.f32 %v1735_v41, %v1733_v34 }
 0x22b   : > { %1505 = vmatmul.msk.f32.vlgmr.msrb.gmra.mxu3 %vm660_vm1, %v699_v42 }
 0x22c   : > { %909 = vmatpush.bf16.msrb.mxu3 %v900_v20 }
 0x233   : > { %1519 = vmatmul.msk.bf16.vlgmr.msra.gmra.mxu3 %vm569_vm0, %v1972_v6 }
 0x234   : > { %1032 = vmatpush.bf16.msra.mxu3 %v1669_v32 }
 0x238   : > { %1033 = vmatpush.bf16.msra.mxu3 %v1668_v33 }
 0x2ae   : > { %v720_v49 = vpop.f32.mrf.mxu3 }
 0x2af   : > { %v724_v50 = vpack.c.bf16 %v720_v49, %v720_v49  ;;  %v1673_v49 = vld [vmem:[%s2209_s7 + $0x38] sm:$0xff] }
 0x2b0   : > { %1187 = vmatpush.bf16.msrb.mxu1 %v1673_v49 }
 0x2b1   : > { %1553 = vmatmul.msk.bf16.vlgmr.msra.gmra.mxu0 %vm660_vm1, %v724_v50  ;;  %v1671_v50 = vld [vmem:[%s2207_s5 + $0x38] sm:$0xff] }
 0x2b6   : > { %v756_v52 = vpop.f32.mrf.mxu3 }
 0x2b7   : > { %v757_v53 = vadd.f32 %v1721_v51, %v756_v52  ;;  %v1672_v51 = vld [vmem:[%s2209_s7 + $0x30] sm:$0xff] }
 0x2b8   : > { %v1670_v52 = vld [vmem:[%s2207_s5 + $0x30] sm:$0xff]  ;;  %1188 = vmatpush.bf16.msrb.mxu1 %v1672_v51 }
 0x2b9   : > { %1549 = vmatmul.msk.f32.vlgmr.msrb.gmra.mxu2 %vm660_vm1, %v757_v53 }
 0x2ba   : > { %997 = vmatpush.bf16.msrb.mxu2 %v1667_v11 }
 0x2bb   : > { %1628 = vmatmul.msk.bf16.vlgmr.msrb.gmra.mxu1 %vm569_vm0, %v1974_v7 }
 0x2be   : > { %v758_v54 = vpop.f32.mrf.mxu3  ;;  %998 = vmatpush.bf16.msrb.mxu2 %v1666_v13 }
 0x32e   : > { %v2054_v57 = vpop.f32.mrf.mxu0 }
 0x336   : > { %v932_v58 = vpop.f32.mrf.mxu0 }
 0x337   : > { %v1108_v58 = vsel %vm898_vm2, %v1599_v56, 0 }
 0x33c   : > { %v853_v59 = vpop.f32.mrf.mxu2 }
 0x33d   : > { %v856_v60 = vmul.f32 0.35355338, %v853_v59  ;;  %v1190_v59 = vpop.f32.mrf.mxu1 }
 0x33f   : > { %v857_v61 = vadd.f32 %v856_v60, %v2008_v22 }
 0x341   : > { %v858_v62 = vsel %vm660_vm1, %v857_v61, -inf }
 0x342   : > { %859 = vmax.xlane.f32.xlu1 %v858_v62 }
 0x3b5   : > { %v860_v3 = vpop.xlane.xlu1 %859 }
 0x3b6   : > { %v861_v5 = vsub.f32 %v857_v61, %v860_v3  ;;  %v1192_v61 = vpop.f32.mrf.mxu1  ;;  %v1675_v3 = vld [vmem:[%s2211_s9 + $0x38] sm:$0xff] }
 0x3b8   : > { %v862_v8 = vmul.f32 1.442695, %v861_v5  ;;  %v1674_v5 = vld [vmem:[%s2211_s9 + $0x30] sm:$0xff] }
 0x3ba   : > { %1736 = vpow2.f32 %v862_v8 }
 0x3c0   : > { %v1737_v9 = vpop.eup %1736 }
 0x3c1   : > { %v864_v10 = vsel %vm660_vm1, %v1737_v9, 0.0 }
 0x3c2   : > { %865 = vadd.xlane.f32.xlu1 %v864_v10 }
 0x435   : > { %v866_v15 = vpop.xlane.xlu1 %865 }
 0x436   : > { %1738 = vrcp.f32 %v866_v15 }
 0x43c   : > { %v1739_v16 = vpop.eup %1738 }
 0x43d   : > { %v868_v17 = vmul.f32 %v1739_v16, %v1737_v9  ;;  %v1728_v16 = vld [vmem:[%s2212_s10 + $0x3] ss:$0 sm:$0xff] }
 0x43f   : > { %1550 = vmatmul.msk.f32.vlgmr.msra.gmra.mxu2 %vm660_vm1, %v868_v17 }
 0x447   : > { %1581 = vmatmul.msk.bf16.vlgmr.msrb.gmra.mxu2 %vm569_vm0, %v1974_v7  ;;  %v1726_v7 = vld [vmem:[%s2210_s8 + $0x3] ss:$0 sm:$0xff] }
 0x4c2   : > { %v889_v24 = vpop.f32.mrf.mxu2 }
 0x4c3   : > { %v894_v25 = vpack.c.bf16 %v889_v24, %v889_v24 }
 0x4c5   : > { %1552 = vmatmul.msk.bf16.vlgmr.msrb.gmra.mxu3 %vm660_vm1, %v894_v25 }
 0x4c6   : > { %1222 = vmatpush.bf16.msrb.mxu3 %v1675_v3 }
 0x4ca   : > { %v1000_v28 = vpop.f32.mrf.mxu2  ;;  %1223 = vmatpush.bf16.msrb.mxu3 %v1674_v5 }
 0x4cb   : > { %v1001_v29 = vadd.f32 %v1723_v26, %v1000_v28  ;;  %v1298_v28 = vsel %vm898_vm2, %v1646_v27, 0 }
 0x4cc   : > { %1307 = vmatpush.bf16.msra.mxu1 %v1298_v28 }
 0x4cd   : > { %1596 = vmatpush.xpose.msk.msrb.mxu0 %vm660_vm1, %v1001_v29 }
 0x4d0   : > { %1597 = vmatmul.msk.f32.vlgmr.msrb.gmra.mxu0 %vm660_vm1, %v966_v30 }
 0x4d1   : > { %1152 = vmatpush.bf16.msra.mxu0 %v1671_v50 }
 0x4d2   : > { %v1002_v31 = vpop.f32.mrf.mxu2 }
 0x4d3   : > { %v1729_v31 = vld [vmem:[%s2214_s12] ss:$0 sm:$0xff] }
 0x4d5   : > { %1595 = vmatmul.msk.bf16.vlgmr.msra.gmra.mxu3 %vm569_vm0, %v2001_v19  ;;  %1153 = vmatpush.bf16.msra.mxu0 %v1670_v52 }
 0x4d8   : > { %1614 = vmatmul.msk.bf16.vlgmr.msra.gmra.mxu0 %vm569_vm0, %v1972_v6  ;;  %v1191_v6 = vadd.f32 %v1726_v7, %v1190_v59  ;;  %v1730_v7 = vld [vmem:[%s2215_s13] ss:$0 sm:$0xff] }
 0x4e5   : > { %1642 = vmatmul.msk.bf16.vlgmr.msrb.gmra.mxu3 %vm569_vm0, %v2001_v19 }
 0x548   : > { %v911_v34 = vpop.f32.mrf.mxu3 }
 0x549   : > { %v931_v8 = vadd.f32 %v2054_v57, %v911_v34 }
 0x54d   : > { %v1062_v35 = vpop.f32.mrf.mxu0 }
 0x54e   : > { %v1065_v36 = vmul.f32 0.35355338, %v1062_v35 }
 0x550   : > { %v913_v37 = vpop.f32.mrf.mxu3  ;;  %v1066_v38 = vadd.f32 %v1065_v36, %v2008_v22 }
 0x552   : > { %v1067_v39 = vsel %vm660_vm1, %v1066_v38, -inf }
 0x553   : > { %1068 = vmax.xlane.f32.xlu2 %v1067_v39 }
 0x555   : > { %v1155_v60 = vpop.f32.mrf.mxu0 }
 0x556   : > { %v1156_v2 = vadd.f32 %v1727_v1, %v1155_v60 }
 0x558   : > { %v1035_v41 = vpop.f32.mrf.mxu3 }
 0x559   : > { %v1036_v42 = vadd.f32 %v1725_v40, %v1035_v41 }
 0x55b   : > { %1096 = vmatpush.msra.mxu2 %v1036_v42 }
 0x55d   : > { %1117 = vmatpush.bf16.msrb.mxu2 %v1108_v58  ;;  %v1157_v62 = vpop.f32.mrf.mxu0 }
 0x560   : > { %v1037_v45 = vpop.f32.mrf.mxu3 }
 0x568   : > { %v1225_v17 = vpop.f32.mrf.mxu3 }
 0x569   : > { %v1226_v18 = vadd.f32 %v1728_v16, %v1225_v17 }
 0x56b   : > { %1286 = vmatpush.msrb.mxu0 %v1226_v18 }
 0x570   : > { %v1227_v19 = vpop.f32.mrf.mxu3 }
 0x5c6   : > { %v1069_v43 = vpop.xlane.xlu2 %1068 }
 0x5c7   : > { %v1070_v44 = vsub.f32 %v1066_v38, %v1069_v43  ;;  %v1816_v38 = vmov 32.0  }
 0x5c9   : > { %v1071_v46 = vmul.f32 1.442695, %v1070_v44 }
 0x5cb   : > { %1740 = vpow2.f32 %v1071_v46 }
 0x5d1   : > { %v1741_v47 = vpop.eup %1740 }
 0x5d2   : > { %v1073_v48 = vsel %vm660_vm1, %v1741_v47, 0.0 }
 0x5d3   : > { %1074 = vadd.xlane.f32.xlu2 %v1073_v48 }
 0x646   : > { %v1075_v53 = vpop.xlane.xlu2 %1074 }
 0x647   : > { %1742 = vrcp.f32 %v1075_v53 }
 0x64d   : > { %v1743_v54 = vpop.eup %1742 }
 0x64e   : > { %v1077_v55 = vmul.f32 %v1743_v54, %v1741_v47 }
 0x650   : > { %1598 = vmatmul.msk.f32.vlgmr.msra.gmra.mxu2 %vm660_vm1, %v1077_v55 }
 0x651   : > { %1643 = vmatpush.xpose.msk.msra.mxu2 %vm660_vm1, %v1191_v6  ;;  %v1731_v6 = vld [vmem:[%s2216_s14] ss:$0 sm:$0xff] }
 0x6d3   : > { %v1098_v63 = vpop.f32.mrf.mxu2 }
 0x6d4   : > { %v1103_v0 = vpack.c.bf16 %v1098_v63, %v1098_v63 }
 0x6d6   : > { %1600 = vmatmul.msk.bf16.vlgmr.msrb.gmra.mxu2 %vm660_vm1, %v1103_v0 }
 0x6e6   : > { %1644 = vmatmul.msk.f32.vlgmr.msra.gmra.mxu2 %vm660_vm1, %v1156_v2 }
 0x759   : > { %v1119_v9 = vpop.f32.mrf.mxu2 }
 0x75a   : > { %v1123_v10 = vadd.f32 %v1119_v9, %v931_v8 }
 0x761   : > { %v1121_v11 = vpop.f32.mrf.mxu2 }
 0x769   : > { %v1252_v12 = vpop.f32.mrf.mxu2 }
 0x76a   : > { %v1255_v13 = vmul.f32 0.35355338, %v1252_v12 }
 0x76c   : > { %v1256_v14 = vadd.f32 %v1255_v13, %v2008_v22 }
 0x76e   : > { %v1257_v15 = vsel %vm660_vm1, %v1256_v14, -inf }
 0x76f   : > { %1258 = vmax.xlane.f32.xlu0 %v1257_v15 }
 0x7e2   : > { %v1259_v57 = vpop.xlane.xlu0 %1258 }
 0x7e3   : > { %v1260_v20 = vsub.f32 %v1256_v14, %v1259_v57 }
 0x7e5   : > { %v1261_v21 = vmul.f32 1.442695, %v1260_v20 }
 0x7e7   : > { %1744 = vpow2.f32 %v1261_v21 }
 0x7ed   : > { %v1745_v23 = vpop.eup %1744 }
 0x7ee   : > { %v1263_v24 = vsel %vm660_vm1, %v1745_v23, 0.0 }
 0x7ef   : > { %1264 = vadd.xlane.f32.xlu1 %v1263_v24 }
 0x862   : > { %v1265_v22 = vpop.xlane.xlu1 %1264 }
 0x863   : > { %1746 = vrcp.f32 %v1265_v22 }
 0x864   : > { %1748 = vrcp.f32 %v1816_v38 }
 0x869   : > { %v1747_v25 = vpop.eup %1746 }
 0x86a   : > { %v1267_v26 = vmul.f32 %v1747_v25, %v1745_v23  ;;  %v1749_v39 = vpop.eup %1748 }
 0x86b   : > { %v1324_v40 = vmul.f32 32.0, %v1749_v39  ;;  %vm1328_vm3 = vweird.f32 %v1749_v39 }
 0x86c   : > { %1645 = vmatmul.msk.f32.vlgmr.msrb.gmra.mxu0 %vm660_vm1, %v1267_v26 }
 0x86d   : > { %v1325_v41 = vsub.f32 1.0, %v1324_v40 }
 0x86f   : > { %v1326_v42 = vmul.f32 %v1749_v39, %v1325_v41 }
 0x871   : > { %v1327_v43 = vadd.f32 %v1749_v39, %v1326_v42 }
 0x873   : > { %v1329_v44 = vsel %vm1328_vm3, %v1749_v39, %v1327_v43 }
 0x8e9   : > { %v1288_v29 = vpop.f32.mrf.mxu0 }
 0x8ea   : > { %v1293_v30 = vpack.c.bf16 %v1288_v29, %v1288_v29 }
 0x8ec   : > { %1647 = vmatmul.msk.bf16.vlgmr.msra.gmra.mxu1 %vm660_vm1, %v1293_v30 }
 0x969   : > { %v1309_v32 = vpop.f32.mrf.mxu1 }
 0x96a   : > { %v1313_v33 = vadd.f32 %v1309_v32, %v1123_v10 }
 0x96c   : > { %v1318_v34 = vadd.f32 %v1729_v31, %v1313_v33 }
 0x96e   : > { %v1319_v35 = vadd.f32 %v1318_v34, %v1968_v4 }
 0x970   : > { %v1320_v36 = vsel %vm569_vm0, %v1319_v35, 0.0 }
 0x971   : > { %v1311_v37 = vpop.f32.mrf.mxu1  ;;  %1321 = vadd.xlane.f32.xlu2 %v1320_v36 }
 0x9e4   : > { %v1322_v45 = vpop.xlane.xlu2 %1321 }
 0x9e5   : > { %v1330_v46 = vmul.f32 %v1329_v44, %v1322_v45 }
 0x9e7   : > { %v1331_v47 = vsub.f32 %v1319_v35, %v1330_v46 }
 0x9e9   : > { %v1332_v48 = vmul.f32 %v1331_v47, %v1331_v47 }
 0x9eb   : > { %v1333_v4 = vsel %vm569_vm0, %v1332_v48, 0.0 }
 0x9ec   : > { %1334 = vadd.xlane.f32.xlu0 %v1333_v4 }
 0xa5f   : > { %v1335_v49 = vpop.xlane.xlu0 %1334 }
 0xa60   : > { %v1336_v50 = vmul.f32 %v1335_v49, %v1329_v44 }
 0xa62   : > { %v1337_v51 = vadd.f32 1e-05, %v1336_v50 }
 0xa64   : > { %1750 = vrsqrt.f32 %v1337_v51  ;;  %vm1344_vm5 = vweird.f32 %v1337_v51 }
 0xa6a   : > { %v1751_v52 = vpop.eup %1750 }
 0xa6b   : > { %v1339_v53 = vmul.f32 %v1751_v52, %v1337_v51  ;;  %vm1345_vm4 = vweird.f32 %v1751_v52 }
 0xa6c   : > { %vm1346_vm6 = vmor %vm1344_vm5, %vm1345_vm4 }
 0xa6d   : > { %v1340_v54 = vmul.f32 %v1751_v52, %v1339_v53 }
 0xa6f   : > { %v1341_v55 = vmul.f32 0.5, %v1340_v54 }
 0xa71   : > { %v1342_v56 = vsub.f32 1.5, %v1341_v55 }
 0xa73   : > { %v1343_v58 = vmul.f32 %v1751_v52, %v1342_v56 }
 0xa75   : > { %v1347_v59 = vsel %vm1346_vm6, %v1751_v52, %v1343_v58 }
 0xa76   : > { %v1348_v60 = vmul.f32 %v1347_v59, %v1331_v47 }
 0xa78   : > { %v1353_v61 = vmul.f32 %v1730_v7, %v1348_v60 }
 0xa7a   : > { %v1358_v62 = vadd.f32 %v1731_v6, %v1353_v61 }
 0xa7c   : > { %1359 = vst.msk [vmem:[%s522_s17] sm:$0xff] %vm569_vm0, %v1358_v62 }
 0xa7d   : > { %1779 = shalt.err (!%p1776_p3)
}
 0xa7e   : > { %1676 = dma.vmem_to_hbm [thread:$0]  (%p1935_p5), %s1374_s22, 128, %s1376_s23, %s1361_s29  }
 0xa7f PF: > { %s2234_s18 = sld [smem:[#allocation7_spill]] }
 0xa80   : > { %s2235_s16 = sld [smem:[#allocation5_spill]] }
 0xa85   : > { %p1682_p4 = scmp.ge.s32.totalorder %s2234_s18, 2 }
 0xa86   : > { %s1387_s0 = sand.u32 1, %s2235_s16  }
 0xa87   : > { %p1679_p7 = pnand %p1682_p4, %p1939_p6  ;;  %s1388_s21 = scalar_lea.sflag [#allocation3], %s1387_s0 }
 0xa89   : > { %p1680_p8 = pneg %p1679_p7 }
 0xa8b   : > { %1797 = dma.done.wait (%p1680_p8), %s1388_s21, 128  }
 0xa8c   : > { %1799 = vsyncadd (%p1680_p8), %s1388_s21, 4294967168  ;;  %s2237_s21 = sld [smem:[#allocation8_spill]]  ;;  %s2240_s18 = smov %s1806_s19 }
 0xa8d   : > { %s2238_s24 = sld [smem:[#allocation6_spill]] }
 0xa8e   : > { %s2239_s20 = sld [smem:[#allocation9_spill]] }
 0xa92   : > { %p25_p9 = scmp.ge.s32.totalorder %s2237_s21, 4  }
 0xa93   : > { %s2241_s19 = smov %s2238_s24 }
 0xa94   :  { %27 = sbr.rel (!%p25_p9) target bundleno = 5 (0x5), region = 145 }
 0xa99   :  { %1394 = vsyncpa [#allocation3], 1 }
 0xa9a   :  { %1396 = vsyncpa [#allocation3 + $0x1], 1 }

</bundles_post_ra>
